<compile_context>
chip_gen: v7x
topology: tpu7x:2x2x1
jax: 0.10.0
libtpu: 0.0.40
codegen_flags: <defaults>
</compile_context>

<pallas_src>
import functools

import numpy as np
import jax
import jax.numpy as jnp
from jax.experimental import pallas as pl
from jax.experimental.pallas import tpu as pltpu

_EPS = 1e-5
_HI = jax.lax.Precision.HIGHEST


# ------------------------------ fused stage kernel --------------------------
def _enc_stage_kernel(*refs, K, pool):
    """One fused encoder stage:
    [maxpool(2)+indices] -> (cheb-conv -> InstanceNorm -> ReLU) x 2."""
    if pool:
        (x_ref, lapt_ref, w1_ref, b1_ref, w2_ref, b2_ref,
         o_ref, idx_ref) = refs
    else:
        x_ref, lapt_ref, w1_ref, b1_ref, w2_ref, b2_ref, o_ref = refs
        idx_ref = None

    lapt = lapt_ref[...]                    # (V, V) == L^T at this resolution

    if pool:
        bc_in, v_in = x_ref.shape
        v = v_in // 2
        # ---- MaxPool1d(kernel=2, return_indices=True) -----------------------
        # Strided lane loads on the input ref + VPU compare/select; no
        # selection matmuls, no O(V^2) selection matrices.
        x_even = x_ref[:, pl.ds(0, v, stride=2)]
        x_odd = x_ref[:, pl.ds(1, v, stride=2)]
        # TODO(synk): strict '>' picks the even (left) index on ties; verify
        # against torch.nn.MaxPool1d(return_indices=True) tie-breaking.
        take_odd = x_odd > x_even
        col = jax.lax.broadcasted_iota(jnp.int32, (bc_in, v), 1)
        idx_ref[...] = 2 * col + take_odd.astype(jnp.int32)
        x = jnp.where(take_odd, x_odd, x_even)            # (B*C_in, V)
    else:
        x = x_ref[...]                                    # (B*C_in, V)

    def cheb_in_relu(xin, w_ref, b_ref):
        # xin: (B*C_in, V) f32; w_ref: block-diagonal (B*C_out, K*B*C_in);
        # b_ref: (B*C_out, 1).
        # Chebyshev recurrence: one lane-dense MXU matmul per order for ALL
        # batches and channels at once.  f32 / HIGHEST precision: the bf16
        # fast path compounded through the recurrence + InstanceNorm and broke
        # the accuracy check.
        xs = [xin]
        if K > 1:
            xs.append(jnp.dot(xin, lapt,
                              preferred_element_type=jnp.float32,
                              precision=_HI))
            for _ in range(2, K):
                xs.append(2.0 * jnp.dot(xs[-1], lapt,
                                        preferred_element_type=jnp.float32,
                                        precision=_HI) - xs[-2])
        xk = jnp.concatenate(xs, axis=0) if K > 1 else xs[0]   # (K*B*C_in, V)
        # Single stacked matmul for all batches via block-diagonal weights
        # (contraction width K*B*C_in; no per-batch loop / concatenates).
        h = jnp.dot(w_ref[...], xk, preferred_element_type=jnp.float32,
                    precision=_HI) + b_ref[...]                # (B*C_out, V)
        # InstanceNorm1d (affine=False, biased variance): single-pass stats.
        inv_n = 1.0 / h.shape[1]
        mean = jnp.sum(h, axis=1, keepdims=True) * inv_n
        var = jnp.sum(h * h, axis=1, keepdims=True) * inv_n - mean * mean
        h = (h - mean) * jax.lax.rsqrt(var + _EPS)
        return jnp.maximum(h, 0.0)                             # ReLU

    h = cheb_in_relu(x, w1_ref, b1_ref)
    h = cheb_in_relu(h, w2_ref, b2_ref)
    o_ref[...] = h.astype(o_ref.dtype)


# ------------------------------ stage wrapper -------------------------------
def _encoder_stage_pallas(x2d, lap_t, bw1, bb1, bw2, bb2, *, K, pool,
                          batch, c_in, c_out):
    """x2d: (B*C_in, V_in).  Returns ((B*C_out, V), indices-or-None)."""
    v_in = x2d.shape[1]
    v = v_in // 2 if pool else v_in
    full = lambda i: (0, 0)
    in_specs = [pl.BlockSpec(a.shape, full)
                for a in (x2d, lap_t, bw1, bb1, bw2, bb2)]

    # vmem limit derived from the actual buffers (double-buffered operands +
    # Chebyshev/IN working set), clamped to 64 MiB so it also fits v7x.
    op_bytes = sum(int(np.prod(a.shape)) * a.dtype.itemsize
                   for a in (x2d, lap_t, bw1, bb1, bw2, bb2))
    out_bytes = batch * c_out * v * 4 + (batch * c_in * v * 4 if pool else 0)
    rows = max(bw1.shape[0], bw2.shape[0], x2d.shape[0])
    work_bytes = (K + 4) * rows * v_in * 4
    vmem_limit = int(min(max(2 * (op_bytes + out_bytes) + work_bytes,
                             32 * 1024 * 1024), 64 * 1024 * 1024))

    cparams = pltpu.CompilerParams(
        dimension_semantics=("arbitrary",),
        vmem_limit_bytes=vmem_limit)
    kernel = functools.partial(_enc_stage_kernel, K=K, pool=pool)

    if pool:
        out_shape = (jax.ShapeDtypeStruct((batch * c_out, v), jnp.float32),
                     jax.ShapeDtypeStruct((batch * c_in, v), jnp.int32))
        out_specs = (pl.BlockSpec((batch * c_out, v), full),
                     pl.BlockSpec((batch * c_in, v), full))
        feat2d, idx2d = pl.pallas_call(
            kernel, out_shape=out_shape, grid=(1,),
            in_specs=in_specs, out_specs=out_specs, compiler_params=cparams,
        )(x2d, lap_t, bw1, bb1, bw2, bb2)
        return feat2d, idx2d

    out_shape = jax.ShapeDtypeStruct((batch * c_out, v), jnp.float32)
    out_specs = pl.BlockSpec((batch * c_out, v), full)
    feat2d = pl.pallas_call(
        kernel, out_shape=out_shape, grid=(1,),
        in_specs=in_specs, out_specs=out_specs, compiler_params=cparams,
    )(x2d, lap_t, bw1, bb1, bw2, bb2)
    return feat2d, None


def _block_diag_weight(wt, batch):
    """wt: (C_out, K, C_in) -> block-diagonal (B*C_out, K*B*C_in)."""
    c_out, k, c_in = wt.shape
    eye = jnp.eye(batch, dtype=wt.dtype)
    big = jnp.einsum('ab,okc->aokbc', eye, wt)       # (B, C_out, K, B, C_in)
    return big.reshape(batch * c_out, k * batch * c_in)


# ------------------------------ encoder "module" ----------------------------
class SphericalUnetEncoderPallas:
    """Pallas-TPU re-implementation of SphericalUnetEncoder.forward."""

    def __init__(self, encoder_depth, enc_channels, in_channels, laplacians,
                 kernel_size, normalization='instance', pooling='max',
                 activation='relu', *, key):
        if encoder_depth != len(enc_channels):
            raise ValueError(
                f'Model depth is {encoder_depth}, but you provide '
                f'`decoder_channels` for {len(enc_channels)} blocks.')
        if (normalization, pooling, activation) != ('instance', 'max', 'relu'):
            raise NotImplementedError(
                "only normalization='instance', pooling='max', "
                "activation='relu' are implemented")
        self.encoder_depth = encoder_depth
        self.kernel_size = kernel_size
        self.laplacians = laplacians
        channels = [in_channels] + list(enc_channels)

        self.stages = []
        for counter in range(encoder_depth):
            n_in = channels[counter]
            n_out = channels[counter + 1]
            n_mid = None
            if counter == 0:
                n_mid = channels[counter + 1] // 2
            elif counter == encoder_depth - 1:
                n_mid = channels[counter + 1]
                n_out = channels[counter]
            if n_mid is None:
                n_mid = n_out
            pool = counter != 0                    # first stage: no pooling
            lap = jnp.asarray(laplacians[counter], jnp.float32)
            key, k1, k2, k3, k4 = jax.random.split(key, 5)
            w1 = (jax.random.normal(k1, (kernel_size * n_in, n_mid),
                                    jnp.float32) / np.sqrt(kernel_size * n_in))
            b1 = jax.random.normal(k2, (n_mid,), jnp.float32) * 0.01
            w2 = (jax.random.normal(k3, (kernel_size * n_mid, n_out),
                                    jnp.float32) / np.sqrt(kernel_size * n_mid))
            b2 = jax.random.normal(k4, (n_out,), jnp.float32) * 0.01
            self.stages.append(dict(
                n_in=n_in, n_mid=n_mid, n_out=n_out, pool=pool,
                lap=lap, w1=w1, b1=b1, w2=w2, b2=b2,
                # kernel-side operands, precomputed once (not per forward):
                lap_t=lap.T,
                w1_t=w1.T.reshape(n_mid, kernel_size, n_in),
                w2_t=w2.T.reshape(n_out, kernel_size, n_mid)))
        self._per_batch = {}   # batch-size -> block-diagonal weights / biases

    def _prepared(self, batch):
        if batch not in self._per_batch:
            prep = []
            for st in self.stages:
                prep.append(dict(
                    bw1=_block_diag_weight(st['w1_t'], batch),
                    bb1=jnp.tile(st['b1'], batch).reshape(
                        batch * st['n_mid'], 1),
                    bw2=_block_diag_weight(st['w2_t'], batch),
                    bb2=jnp.tile(st['b2'], batch).reshape(
                        batch * st['n_out'], 1)))
            self._per_batch[batch] = prep
        return self._per_batch[batch]

    def __call__(self, x):
        batch = x.shape[0]
        prep = self._prepared(batch)
        features, indices = [], []
        for st, pw in zip(self.stages, prep):
            x2d = x.reshape(batch * st['n_in'], x.shape[-1])
            feat2d, idx2d = _encoder_stage_pallas(
                x2d, st['lap_t'], pw['bw1'], pw['bb1'], pw['bw2'], pw['bb2'],
                K=self.kernel_size, pool=st['pool'], batch=batch,
                c_in=st['n_in'], c_out=st['n_out'])
            v = feat2d.shape[1]
            x = feat2d.reshape(batch, st['n_out'], v)
            features.append(x)
            indices.append(None if idx2d is None
                           else idx2d.reshape(batch, st['n_in'], v))
        return features, indices


# ------------------------- pure-JAX reference (check) -----------------------
def _ref_cheb(L, x, w, K):
    # x: (B, C, V) NCW; w: (K*C, C_out) row-stacked per Chebyshev order.
    xs = [x]
    if K > 1:
        xs.append(jnp.einsum('uv,bcv->bcu', L, x, precision=_HI))
        for _ in range(2, K):
            xs.append(2.0 * jnp.einsum('uv,bcv->bcu', L, xs[-1], precision=_HI)
                      - xs[-2])
    xk = jnp.concatenate(xs, axis=1)                 # (B, K*C, V)
    return jnp.einsum('bkv,ko->bov', xk, w, precision=_HI)


def _ref_block(L, x, w, b, K):
    y = _ref_cheb(L, x, w, K) + b[None, :, None]
    mean = jnp.mean(y, axis=2, keepdims=True)
    var = jnp.mean((y - mean) ** 2, axis=2, keepdims=True)
    return jnp.maximum((y - mean) / jnp.sqrt(var + _EPS), 0.0)


def _ref_maxpool(x):
    B, C, Vin = x.shape
    V = Vin // 2
    xp = x.reshape(B, C, V, 2)
    left, right = xp[..., 0], xp[..., 1]
    take_r = right > left
    out = jnp.where(take_r, right, left)
    idx = (2 * jnp.arange(V, dtype=jnp.int32)[None, None, :]
           + take_r.astype(jnp.int32))
    return out, idx


def reference_encoder(x, stages, K):
    feats, inds = [], []
    for st in stages:
        idx = None
        if st['pool']:
            x, idx = _ref_maxpool(x)
        x = _ref_block(st['lap'], x, st['w1'], st['b1'], K)
        x = _ref_block(st['lap'], x, st['w2'], st['b2'], K)
        feats.append(x)
        inds.append(idx)
    return feats, inds


# ----------------------------------- main -----------------------------------
if __name__ == "__main__":
    key = jax.random.PRNGKey(0)
    B = 2
    encoder_depth = 3
    in_channels = 4
    enc_channels = [8, 16, 32]
    K = 3                 # Chebyshev kernel size
    V0 = 64               # finest sphere resolution

    # Dense rescaled ring-graph Laplacians, finest -> coarsest (64, 32, 16
    # vertices); stage i convolves at V0 // 2**i.
    def ring_laplacian(n):
        I = jnp.eye(n, dtype=jnp.float32)
        A = jnp.roll(I, 1, axis=1) + jnp.roll(I, -1, axis=1)
        L = 2.0 * I - A
        return 0.5 * L - I            # 2*L/lmax - I with lmax = 4
    laplacians = [ring_laplacian(64), ring_laplacian(32), ring_laplacian(16)]

    key, kx, kp = jax.random.split(key, 3)
    x = jax.random.normal(kx, (B, in_channels, V0), jnp.float32)   # NCW

    model = SphericalUnetEncoderPallas(encoder_depth, enc_channels, in_channels,
                                       laplacians, K, key=kp)
    feats, inds = model(x)
    feats = [jax.block_until_ready(f) for f in feats]
    inds = [None if i is None else jax.block_until_ready(i) for i in inds]

    assert [f.shape for f in feats] == [(B, 8, 64), (B, 16, 32), (B, 16, 16)]
    assert inds[0] is None
    assert inds[1].shape == (B, 8, 32) and inds[2].shape == (B, 16, 16)

    ref_feats, ref_inds = reference_encoder(x, model.stages, K)
    for f, rf in zip(feats, ref_feats):
        np.testing.assert_allclose(np.asarray(f), np.asarray(rf),
                                   atol=1e-3, rtol=1e-3)
    for i, ri in zip(inds, ref_inds):
        if ri is None:
            assert i is None
        else:
            np.testing.assert_array_equal(np.asarray(i), np.asarray(ri))
    print("KERNEL_OK")
</pallas_src>

<mosaic_0001>
module attributes {stable_mosaic.version = 11 : i64} {
  func.func @_enc_stage_kernel(%arg0: i32, %arg1: memref<8x64xf32, #tpu.memory_space<vmem>>, %arg2: memref<64x64xf32, #tpu.memory_space<vmem>>, %arg3: memref<8x24xf32, #tpu.memory_space<vmem>>, %arg4: memref<8x1xf32, #tpu.memory_space<vmem>>, %arg5: memref<16x24xf32, #tpu.memory_space<vmem>>, %arg6: memref<16x1xf32, #tpu.memory_space<vmem>>, %arg7: memref<16x64xf32, #tpu.memory_space<vmem>>) attributes {dimension_semantics = [#tpu.dimension_semantics<arbitrary>], iteration_bounds = array<i64: 1>, scalar_prefetch = 0 : i64, scratch_operands = 0 : i64, tpu.core_type = #tpu.core_type<tc>, window_params = [{pipeline_mode = #tpu.pipeline_mode<synchronous>, transform_indices = @transform_0, window_bounds = array<i64: 8, 64>}, {pipeline_mode = #tpu.pipeline_mode<synchronous>, transform_indices = @transform_1, window_bounds = array<i64: 64, 64>}, {pipeline_mode = #tpu.pipeline_mode<synchronous>, transform_indices = @transform_2, window_bounds = array<i64: 8, 24>}, {pipeline_mode = #tpu.pipeline_mode<synchronous>, transform_indices = @transform_3, window_bounds = array<i64: 8, 1>}, {pipeline_mode = #tpu.pipeline_mode<synchronous>, transform_indices = @transform_4, window_bounds = array<i64: 16, 24>}, {pipeline_mode = #tpu.pipeline_mode<synchronous>, transform_indices = @transform_5, window_bounds = array<i64: 16, 1>}, {pipeline_mode = #tpu.pipeline_mode<synchronous>, transform_indices = @transform_6, window_bounds = array<i64: 16, 64>}]} {
    %c0 = arith.constant 0 : index
    %c0_0 = arith.constant 0 : index
    %0 = vector.load %arg2[%c0, %c0_0] : memref<64x64xf32, #tpu.memory_space<vmem>>, vector<64x64xf32>
    %c0_1 = arith.constant 0 : index
    %c0_2 = arith.constant 0 : index
    %1 = vector.load %arg1[%c0_1, %c0_2] : memref<8x64xf32, #tpu.memory_space<vmem>>, vector<8x64xf32>
    %cst = arith.constant dense<0.000000e+00> : vector<8x64xf32>
    %2 = tpu.matmul %1, %0, %cst {dimension_numbers = #tpu.dot_dimension_numbers<[1], [0], [0], [1], [0, 0, 1, 1], [], []>, precision = #tpu.contract_precision<fp32>} : vector<8x64xf32>, vector<64x64xf32>, vector<8x64xf32> -> vector<8x64xf32>
    %cst_3 = arith.constant dense<0.000000e+00> : vector<8x64xf32>
    %3 = tpu.matmul %2, %0, %cst_3 {dimension_numbers = #tpu.dot_dimension_numbers<[1], [0], [0], [1], [0, 0, 1, 1], [], []>, precision = #tpu.contract_precision<fp32>} : vector<8x64xf32>, vector<64x64xf32>, vector<8x64xf32> -> vector<8x64xf32>
    %cst_4 = arith.constant 2.000000e+00 : f32
    %4 = vector.broadcast %cst_4 : f32 to vector<8x64xf32>
    %5 = arith.mulf %4, %3 : vector<8x64xf32>
    %6 = arith.subf %5, %1 : vector<8x64xf32>
    %7 = tpu.concatenate %1, %2, %6 in 0 : vector<8x64xf32>, vector<8x64xf32>, vector<8x64xf32> -> vector<24x64xf32>
    %c0_5 = arith.constant 0 : index
    %c0_6 = arith.constant 0 : index
    %8 = vector.load %arg3[%c0_5, %c0_6] : memref<8x24xf32, #tpu.memory_space<vmem>>, vector<8x24xf32>
    %cst_7 = arith.constant dense<0.000000e+00> : vector<8x64xf32>
    %9 = tpu.matmul %8, %7, %cst_7 {dimension_numbers = #tpu.dot_dimension_numbers<[1], [0], [0], [1], [0, 0, 1, 1], [], []>, precision = #tpu.contract_precision<fp32>} : vector<8x24xf32>, vector<24x64xf32>, vector<8x64xf32> -> vector<8x64xf32>
    %c0_8 = arith.constant 0 : index
    %c0_9 = arith.constant 0 : index
    %10 = vector.load %arg4[%c0_8, %c0_9] : memref<8x1xf32, #tpu.memory_space<vmem>>, vector<8x1xf32>
    %11 = vector.broadcast %10 : vector<8x1xf32> to vector<8x64xf32>
    %12 = arith.addf %9, %11 : vector<8x64xf32>
    %cst_10 = arith.constant dense<0.000000e+00> : vector<8xf32>
    %13 = vector.multi_reduction <add>, %12, %cst_10 [1] : vector<8x64xf32> to vector<8xf32>
    %14 = vector.shape_cast %13 : vector<8xf32> to vector<8x1xf32>
    %cst_11 = arith.constant 1.562500e-02 : f32
    %15 = vector.broadcast %cst_11 : f32 to vector<8x1xf32>
    %16 = arith.mulf %14, %15 : vector<8x1xf32>
    %17 = arith.mulf %12, %12 : vector<8x64xf32>
    %cst_12 = arith.constant dense<0.000000e+00> : vector<8xf32>
    %18 = vector.multi_reduction <add>, %17, %cst_12 [1] : vector<8x64xf32> to vector<8xf32>
    %19 = vector.shape_cast %18 : vector<8xf32> to vector<8x1xf32>
    %cst_13 = arith.constant 1.562500e-02 : f32
    %20 = vector.broadcast %cst_13 : f32 to vector<8x1xf32>
    %21 = arith.mulf %19, %20 : vector<8x1xf32>
    %22 = arith.mulf %16, %16 : vector<8x1xf32>
    %23 = arith.subf %21, %22 : vector<8x1xf32>
    %24 = vector.broadcast %16 : vector<8x1xf32> to vector<8x64xf32>
    %25 = arith.subf %12, %24 : vector<8x64xf32>
    %cst_14 = arith.constant 9.99999974E-6 : f32
    %26 = vector.broadcast %cst_14 : f32 to vector<8x1xf32>
    %27 = arith.addf %23, %26 : vector<8x1xf32>
    %28 = math.rsqrt %27 : vector<8x1xf32>
    %29 = vector.broadcast %28 : vector<8x1xf32> to vector<8x64xf32>
    %30 = arith.mulf %25, %29 : vector<8x64xf32>
    %cst_15 = arith.constant 0.000000e+00 : f32
    %31 = vector.broadcast %cst_15 : f32 to vector<8x64xf32>
    %32 = arith.maximumf %30, %31 : vector<8x64xf32>
    %cst_16 = arith.constant dense<0.000000e+00> : vector<8x64xf32>
    %33 = tpu.matmul %32, %0, %cst_16 {dimension_numbers = #tpu.dot_dimension_numbers<[1], [0], [0], [1], [0, 0, 1, 1], [], []>, precision = #tpu.contract_precision<fp32>} : vector<8x64xf32>, vector<64x64xf32>, vector<8x64xf32> -> vector<8x64xf32>
    %cst_17 = arith.constant dense<0.000000e+00> : vector<8x64xf32>
    %34 = tpu.matmul %33, %0, %cst_17 {dimension_numbers = #tpu.dot_dimension_numbers<[1], [0], [0], [1], [0, 0, 1, 1], [], []>, precision = #tpu.contract_precision<fp32>} : vector<8x64xf32>, vector<64x64xf32>, vector<8x64xf32> -> vector<8x64xf32>
    %cst_18 = arith.constant 2.000000e+00 : f32
    %35 = vector.broadcast %cst_18 : f32 to vector<8x64xf32>
    %36 = arith.mulf %35, %34 : vector<8x64xf32>
    %37 = arith.subf %36, %32 : vector<8x64xf32>
    %38 = tpu.concatenate %32, %33, %37 in 0 : vector<8x64xf32>, vector<8x64xf32>, vector<8x64xf32> -> vector<24x64xf32>
    %c0_19 = arith.constant 0 : index
    %c0_20 = arith.constant 0 : index
    %39 = vector.load %arg5[%c0_19, %c0_20] : memref<16x24xf32, #tpu.memory_space<vmem>>, vector<16x24xf32>
    %cst_21 = arith.constant dense<0.000000e+00> : vector<16x64xf32>
    %40 = tpu.matmul %39, %38, %cst_21 {dimension_numbers = #tpu.dot_dimension_numbers<[1], [0], [0], [1], [0, 0, 1, 1], [], []>, precision = #tpu.contract_precision<fp32>} : vector<16x24xf32>, vector<24x64xf32>, vector<16x64xf32> -> vector<16x64xf32>
    %c0_22 = arith.constant 0 : index
    %c0_23 = arith.constant 0 : index
    %41 = vector.load %arg6[%c0_22, %c0_23] : memref<16x1xf32, #tpu.memory_space<vmem>>, vector<16x1xf32>
    %42 = vector.broadcast %41 : vector<16x1xf32> to vector<16x64xf32>
    %43 = arith.addf %40, %42 : vector<16x64xf32>
    %cst_24 = arith.constant dense<0.000000e+00> : vector<16xf32>
    %44 = vector.multi_reduction <add>, %43, %cst_24 [1] : vector<16x64xf32> to vector<16xf32>
    %45 = vector.shape_cast %44 : vector<16xf32> to vector<16x1xf32>
    %cst_25 = arith.constant 1.562500e-02 : f32
    %46 = vector.broadcast %cst_25 : f32 to vector<16x1xf32>
    %47 = arith.mulf %45, %46 : vector<16x1xf32>
    %48 = arith.mulf %43, %43 : vector<16x64xf32>
    %cst_26 = arith.constant dense<0.000000e+00> : vector<16xf32>
    %49 = vector.multi_reduction <add>, %48, %cst_26 [1] : vector<16x64xf32> to vector<16xf32>
    %50 = vector.shape_cast %49 : vector<16xf32> to vector<16x1xf32>
    %cst_27 = arith.constant 1.562500e-02 : f32
    %51 = vector.broadcast %cst_27 : f32 to vector<16x1xf32>
    %52 = arith.mulf %50, %51 : vector<16x1xf32>
    %53 = arith.mulf %47, %47 : vector<16x1xf32>
    %54 = arith.subf %52, %53 : vector<16x1xf32>
    %55 = vector.broadcast %47 : vector<16x1xf32> to vector<16x64xf32>
    %56 = arith.subf %43, %55 : vector<16x64xf32>
    %cst_28 = arith.constant 9.99999974E-6 : f32
    %57 = vector.broadcast %cst_28 : f32 to vector<16x1xf32>
    %58 = arith.addf %54, %57 : vector<16x1xf32>
    %59 = math.rsqrt %58 : vector<16x1xf32>
    %60 = vector.broadcast %59 : vector<16x1xf32> to vector<16x64xf32>
    %61 = arith.mulf %56, %60 : vector<16x64xf32>
    %cst_29 = arith.constant 0.000000e+00 : f32
    %62 = vector.broadcast %cst_29 : f32 to vector<16x64xf32>
    %63 = arith.maximumf %61, %62 : vector<16x64xf32>
    %c0_30 = arith.constant 0 : index
    %c0_31 = arith.constant 0 : index
    %64 = vector.load %arg7[%c0_30, %c0_31] : memref<16x64xf32, #tpu.memory_space<vmem>>, vector<16x64xf32>
    tpu.vector_store %arg7[%c0_30, %c0_31], %63 {strides = array<i32>} : memref<16x64xf32, #tpu.memory_space<vmem>>, vector<16x64xf32>,
    return
  }
  func.func @transform_0(%arg0: i32) -> (i32, i32) {
    %c0_i32 = arith.constant 0 : i32
    %c0_i32_0 = arith.constant 0 : i32
    %c0_i32_1 = arith.constant 0 : i32
    return %c0_i32, %c0_i32_0 : i32, i32
  }
  func.func @transform_1(%arg0: i32) -> (i32, i32) {
    %c0_i32 = arith.constant 0 : i32
    %c0_i32_0 = arith.constant 0 : i32
    %c0_i32_1 = arith.constant 0 : i32
    return %c0_i32, %c0_i32_0 : i32, i32
  }
  func.func @transform_2(%arg0: i32) -> (i32, i32) {
    %c0_i32 = arith.constant 0 : i32
    %c0_i32_0 = arith.constant 0 : i32
    %c0_i32_1 = arith.constant 0 : i32
    return %c0_i32, %c0_i32_0 : i32, i32
  }
  func.func @transform_3(%arg0: i32) -> (i32, i32) {
    %c0_i32 = arith.constant 0 : i32
    %c0_i32_0 = arith.constant 0 : i32
    %c0_i32_1 = arith.constant 0 : i32
    return %c0_i32, %c0_i32_0 : i32, i32
  }
  func.func @transform_4(%arg0: i32) -> (i32, i32) {
    %c0_i32 = arith.constant 0 : i32
    %c0_i32_0 = arith.constant 0 : i32
    %c0_i32_1 = arith.constant 0 : i32
    return %c0_i32, %c0_i32_0 : i32, i32
  }
  func.func @transform_5(%arg0: i32) -> (i32, i32) {
    %c0_i32 = arith.constant 0 : i32
    %c0_i32_0 = arith.constant 0 : i32
    %c0_i32_1 = arith.constant 0 : i32
    return %c0_i32, %c0_i32_0 : i32, i32
  }
  func.func @transform_6(%arg0: i32) -> (i32, i32) {
    %c0_i32 = arith.constant 0 : i32
    %c0_i32_0 = arith.constant 0 : i32
    %c0_i32_1 = arith.constant 0 : i32
    return %c0_i32, %c0_i32_0 : i32, i32
  }
}

</mosaic_0001>

<bundles_post_ra>
// kernel: tpu_custom_call.1
= control target key start
LH: loop header
LB: loop body
LE: loop exit
PB: predicated region body
PF: predicated region fallthrough
CT: control target
= control target key end

     0   :  { %11 = vsyncpa [#allocation3], 0  ;;  %s5121_s0 = inlined_call_operand.vmem [shape: f32[8,64], index: 0, kind: input, shape index: {}]   ;;  %s5122_s1 = inlined_call_operand.hbm [shape: f32[64,64], index: 1, kind: input, shape index: {}]   ;;  %s5123_s2 = inlined_call_operand.vmem [shape: f32[8,24], index: 2, kind: input, shape index: {}]   ;;  %s5124_s3 = inlined_call_operand.vmem [shape: f32[8,1], index: 3, kind: input, shape index: {}]   ;;  %s5125_s4 = inlined_call_operand.vmem [shape: f32[16,24], index: 4, kind: input, shape index: {}]   ;;  %s5126_s5 = inlined_call_operand.vmem [shape: f32[16,1], index: 5, kind: input, shape index: {}]   ;;  %s5127_s6 = inlined_call_operand.hbm [shape: f32[16,64], index: 6, kind: output, shape index: {}]  }
   0x1   :  { %12 = vsyncpa [#allocation4], 0  ;;  %s4588_s21 = smov [#allocation2]   ;;  %s4540_s25 = scalar_lea.hbm %s5122_s1, 1024 }
   0x2   :  { %s20_s22 = sshll.u32 %s4588_s21, 4  ;;  %p4541_p0 = scmp.ne.s32.totalorder %s5122_s1, %s4540_s25  ;;  %s21_s22 = int_to_ptr.vmem [resolvable:$true] %s20_s22 }
   0x3   :  { %p4544_p1 = scmp.lt.u32.totalorder %s4540_s25, %s5122_s1 }
   0x5   :  { %p4546_p2 = pnand %p4544_p1, %p4541_p0 }
   0x7   :  { %4549 = shalt.err (!%p4546_p2)
}
   0x8   :  { %s4550_s30 = scalar_lea.vmem %s21_s22, 1024  ;;  %p4555_p4 = scmp.lt.s32.totalorder %s21_s22, %s21_s22 }
   0x9   :  { %p4551_p3 = scmp.ne.s32.totalorder %s21_s22, %s4550_s30  ;;  %p4556_p5 = scmp.lt.s32.totalorder %s4550_s30, %s4550_s30 }
   0xb   :  { %p4557_p6 = por %p4556_p5, %p4555_p4 }
   0xd   :  { %p4558_p7 = pnand %p4557_p6, %p4551_p3 }
   0xf   :  { %4561 = shalt.err (!%p4558_p7)
}
  0x10   :  { %s4589_s7 = smov 128   ;;  %s4590_s8 = smov 8  }
  0x11   :  { %26 = dma.hbm_to_vmem [thread:$0]  %s5122_s1, 1024, %s21_s22, [#allocation3], %s4589_s7, %s4589_s7, %s4590_s8  }
  0x12   :  { %4584 = dma.done.wait [#allocation3], 1024  }
  0x13   :  { %4585 = vsyncadd [#allocation3], 4294966272  ;;  %v4591_v0 = vmov 0.0|0.0   ;;  %vm4592_vm0 = vmmov 0   ;;  %v4593_v1 = vmov 0.0   ;;  %v38_v2 = vld [vmem:[#allocation2] sm:$0xff] }
  0x14   :  { %4131 = vmatprep.subr.bf16.mxu0 %v4591_v0  ;;  %3583 = vmatprep.mubr.msk.f32.mxu0 %vm4592_vm0, %v4593_v1  ;;  %v39_v3 = vld [vmem:[#allocation2 + $0x8] sm:$0xff]  ;;  %v40_v4 = vld [vmem:[#allocation2 + $0x10] sm:$0xff]  ;;  %vm47_vm1 = vcmask 523264   ;;  %v52_v5 = vand.u32 4294901760, %v38_v2  ;;  %v41_v7 = vld [vmem:[#allocation2 + $0x18] sm:$0xff]  ;;  %vm1137_vm2 = vcmask 195584  }
  0x15   :  { %4203 = vmatprep.subr.bf16.mxu1 %v4591_v0  ;;  %3697 = vmatprep.mubr.msk.f32.mxu1 %vm4592_vm0, %v4593_v1  ;;  %v55_v6 = vand.u32 4294901760, %v39_v3  ;;  %v58_v8 = vand.u32 4294901760, %v40_v4  ;;  %v42_v9 = vld [vmem:[#allocation2 + $0x20] sm:$0xff]  ;;  %v43_v10 = vld [vmem:[#allocation2 + $0x28] sm:$0xff]  ;;  %v61_v11 = vand.u32 4294901760, %v41_v7  ;;  %v44_v17 = vld [vmem:[#allocation2 + $0x30] sm:$0xff] }
  0x16   :  { %v4655_v12 = vld [vmem:[%s5121_s0] sm:$0xff]  ;;  %v64_v15 = vand.u32 4294901760, %v42_v9  ;;  %v67_v16 = vand.u32 4294901760, %v43_v10  ;;  %v45_v18 = vld [vmem:[#allocation2 + $0x38] sm:$0xff]  ;;  %v4663_v20 = vsub.f32 %v38_v2, %v52_v5  ;;  %v70_v27 = vand.u32 4294901760, %v44_v17 }
  0x17   :  { %v4657_v13 = vpack.c.bf16 %v55_v6, %v52_v5  ;;  %v49_v14 = vsel %vm47_vm1, %v4655_v12, 0  ;;  %v4666_v21 = vpack.c.bf16 %v61_v11, %v58_v8  ;;  %v4668_v22 = vsub.f32 %v39_v3, %v55_v6 }
  0x18   :  { %v4661_v19 = vand.u32 4294901760, %v49_v14  ;;  %v4670_v23 = vsub.f32 %v40_v4, %v58_v8  ;;  %v4672_v24 = vsub.f32 %v41_v7, %v61_v11  ;;  %v137_v26 = vand.u32 4294901760, %v4663_v20 }
  0x19   :  { %4133 = vmatpush3.bf16.msra.mxu0 %v4657_v13  ;;  %4205 = vmatpush3.bf16.msra.mxu1 %v4657_v13  ;;  %v73_v28 = vand.u32 4294901760, %v45_v18  ;;  %v144_v29 = vand.u32 4294901760, %v4668_v22  ;;  %v4684_v32 = vsub.f32 %v42_v9, %v64_v15  ;;  %v4686_v33 = vsub.f32 %v43_v10, %v67_v16 }
  0x1a   :  { %4134 = vmatprep.subr.bf16.mxu0 %v4591_v0  ;;  %v4676_v25 = vsub.f32 %v49_v14, %v4661_v19  ;;  %4206 = vmatprep.subr.bf16.mxu1 %v4591_v0  ;;  %v151_v31 = vand.u32 4294901760, %v4670_v23  ;;  %v4689_v34 = vpack.c.bf16 %v67_v16, %v64_v15  ;;  %v138_v35 = vsub.f32 %v4663_v20, %v137_v26 }
  0x1b   :  { %v145_v36 = vsub.f32 %v4668_v22, %v144_v29  ;;  %v158_v37 = vand.u32 4294901760, %v4672_v24  ;;  %v4700_v38 = vpack.c.bf16 %v73_v28, %v70_v27  ;;  %v4702_v39 = vsub.f32 %v44_v17, %v70_v27 }
  0x1c   :  { %v126_v30 = vand.u32 4294901760, %v4676_v25  ;;  %v152_v41 = vsub.f32 %v4670_v23, %v151_v31  ;;  %v165_v42 = vand.u32 4294901760, %v4684_v32  ;;  %v172_v43 = vand.u32 4294901760, %v4686_v33 }
  0x1d   :  { %4136 = vmatpush3.bf16.msra.mxu0 %v4666_v21  ;;  %4208 = vmatpush3.bf16.msra.mxu1 %v4666_v21  ;;  %v139_v44 = vand.u32 4294901760, %v138_v35  ;;  %v146_v45 = vand.u32 4294901760, %v145_v36  ;;  %v159_v46 = vsub.f32 %v4672_v24, %v158_v37  ;;  %v4717_v47 = vsub.f32 %v45_v18, %v73_v28  ;;  %v1130_v28 = vld [vmem:[%s5123_s2] sm:$0xff] }
  0x1e   :  { %4137 = vmatprep.subr.bf16.mxu0 %v4591_v0  ;;  %4209 = vmatprep.subr.bf16.mxu1 %v4591_v0  ;;  %v127_v40 = vsub.f32 %v4676_v25, %v126_v30  ;;  %v166_v49 = vsub.f32 %v4684_v32, %v165_v42  ;;  %v173_v50 = vsub.f32 %v4686_v33, %v172_v43  ;;  %v179_v51 = vand.u32 4294901760, %v4702_v39 }
  0x1f   :  { %v4730_v52 = vpack.c.bf16 %v146_v45, %v139_v44  ;;  %v153_v53 = vand.u32 4294901760, %v152_v41  ;;  %v160_v54 = vand.u32 4294901760, %v159_v46  ;;  %v186_v55 = vand.u32 4294901760, %v4717_v47 }
  0x20   :  { %v128_v48 = vand.u32 4294901760, %v127_v40  ;;  %v180_v56 = vsub.f32 %v4702_v39, %v179_v51  ;;  %v167_v58 = vand.u32 4294901760, %v166_v49  ;;  %v174_v59 = vand.u32 4294901760, %v173_v50 }
  0x21   :  { %4139 = vmatpush3.bf16.msra.mxu0 %v4689_v34  ;;  %4211 = vmatpush3.bf16.msra.mxu1 %v4689_v34  ;;  %v4738_v57 = vpack.c.bf16 %v160_v54, %v153_v53  ;;  %v187_v60 = vsub.f32 %v4717_v47, %v186_v55  ;;  %v4755_v3 = vpack.c.bf16 %v4668_v22, %v4663_v20  ;;  %v1142_v11 = vand.u32 4294901760, %v4655_v12 }
  0x22   :  { %4140 = vmatprep.subr.bf16.mxu0 %v4591_v0  ;;  %4212 = vmatprep.subr.bf16.mxu1 %v4591_v0  ;;  %v4745_v61 = vpack.c.bf16 %v174_v59, %v167_v58  ;;  %v181_v62 = vand.u32 4294901760, %v180_v56  ;;  %v4762_v4 = vpack.c.bf16 %v4672_v24, %v4670_v23  ;;  %v4770_v5 = vpack.c.bf16 %v4686_v33, %v4684_v32 }
  0x23   :  { %v188_v63 = vand.u32 4294901760, %v187_v60  ;;  %v4776_v6 = vpack.c.bf16 %v4717_v47, %v4702_v39  ;;  %v4795_v7 = vpack.c.bf16 %v144_v29, %v137_v26  ;;  %v4805_v8 = vpack.c.bf16 %v158_v37, %v151_v31  ;;  %v1131_v26 = vld [vmem:[%s5124_s3] sm:$0xff] }
  0x24   :  { %v4815_v9 = vpack.c.bf16 %v172_v43, %v165_v42  ;;  %v4819_v10 = vpack.c.bf16 %v186_v55, %v179_v51  ;;  %v4594_v27 = vmov 0   ;;  %v1139_v29 = vsel %vm1137_vm2, %v1130_v28, 0 }
  0x25   :  { %4142 = vmatpush3.bf16.msra.mxu0 %v4700_v38  ;;  %4214 = vmatpush3.bf16.msra.mxu1 %v4700_v38  ;;  %v4749_v2 = vpack.c.bf16 %v188_v63, %v181_v62  ;;  %v1221_v31 = vsub.f32 %v4655_v12, %v1142_v11 }
  0x26   :  { %4143 = vmatprep.subr.bf16.mxu0 %v4591_v0  ;;  %4215 = vmatprep.subr.bf16.mxu1 %v4591_v0 }
  0x27   :  { %4532 = vset.pattern.permute.xlu0 %v4594_v27  ;;  %4533 = vset.pattern.permute.xlu1 %v4594_v27  ;;  %v1222_v35 = vand.u32 4294901760, %v1221_v31 }
  0x28   :  { %3584 = vmatmul.mubr.f32.vlgmr.msra.gmra.mrb[0].mxu0 %v128_v48  ;;  %1134 = vperm.xlu0 %4532, %v1131_v26  }
  0x29   :  { %4145 = vmatpush3.bf16.msra.mxu0 %v4730_v52  ;;  %3602 = vmatprep.mubr.msk.f32.mxu0 %vm4592_vm0, %v4593_v1  ;;  %v1223_v39 = vsub.f32 %v1221_v31, %v1222_v35 }
  0x2a   :  { %4146 = vmatprep.subr.bf16.mxu0 %v4591_v0 }
  0x2b   :  { %v1224_v46 = vand.u32 4294901760, %v1223_v39 }
  0x2d   :  { %4148 = vmatpush3.bf16.msra.mxu0 %v4738_v57 }
  0x2e   :  { %4149 = vmatprep.subr.bf16.mxu0 %v4591_v0 }
  0x31   :  { %4151 = vmatpush3.bf16.msra.mxu0 %v4745_v61 }
  0x32   :  { %4152 = vmatprep.subr.bf16.mxu0 %v4591_v0 }
  0x35   :  { %4154 = vmatpush3.bf16.msra.mxu0 %v4749_v2 }
  0x36   :  { %4155 = vmatprep.subr.bf16.mxu0 %v4591_v0 }
  0x38   :  { %3603 = vmatmul.mubr.f32.vlgmr.msra.gmra.mrb[0].mxu0 %v4661_v19 }
  0x39   :  { %4157 = vmatpush3.bf16.msra.mxu0 %v4755_v3  ;;  %3621 = vmatprep.mubr.msk.f32.mxu0 %vm4592_vm0, %v4593_v1 }
  0x3a   :  { %4158 = vmatprep.subr.bf16.mxu0 %v4591_v0 }
  0x3d   :  { %4160 = vmatpush3.bf16.msra.mxu0 %v4762_v4 }
  0x3e   :  { %4161 = vmatprep.subr.bf16.mxu0 %v4591_v0 }
  0x41   :  { %4163 = vmatpush3.bf16.msra.mxu0 %v4770_v5 }
  0x42   :  { %4164 = vmatprep.subr.bf16.mxu0 %v4591_v0 }
  0x45   :  { %4166 = vmatpush3.bf16.msra.mxu0 %v4776_v6 }
  0x46   :  { %4167 = vmatprep.subr.bf16.mxu0 %v4591_v0 }
  0x48   :  { %3622 = vmatmul.mubr.f32.vlgmr.msra.gmra.mrb[0].mxu0 %v4676_v25 }
  0x49   :  { %4169 = vmatpush3.bf16.msra.mxu0 %v4657_v13  ;;  %3640 = vmatprep.mubr.msk.f32.mxu0 %vm4592_vm0, %v4593_v1 }
  0x4a   :  { %4170 = vmatprep.subr.bf16.mxu0 %v4591_v0 }
  0x4d   :  { %4172 = vmatpush3.bf16.msra.mxu0 %v4666_v21 }
  0x4e   :  { %4173 = vmatprep.subr.bf16.mxu0 %v4591_v0 }
  0x51   :  { %4175 = vmatpush3.bf16.msra.mxu0 %v4689_v34 }
  0x52   :  { %4176 = vmatprep.subr.bf16.mxu0 %v4591_v0 }
  0x55   :  { %4178 = vmatpush3.bf16.msra.mxu0 %v4700_v38 }
  0x56   :  { %4179 = vmatprep.subr.bf16.mxu0 %v4591_v0 }
  0x58   :  { %3641 = vmatmul.mubr.f32.vlgmr.msra.gmra.mrb[0].mxu0 %v126_v30  ;;  %v1209_v30 = vand.u32 4294901760, %v1139_v29 }
  0x59   :  { %4181 = vmatpush3.bf16.msra.mxu0 %v4795_v7  ;;  %3659 = vmatprep.mubr.msk.f32.mxu0 %vm4592_vm0, %v4593_v1 }
  0x5a   :  { %4182 = vmatprep.subr.bf16.mxu0 %v4591_v0  ;;  %v1210_v32 = vsub.f32 %v1139_v29, %v1209_v30 }
  0x5c   :  { %v1211_v36 = vand.u32 4294901760, %v1210_v32 }
  0x5d   :  { %4184 = vmatpush3.bf16.msra.mxu0 %v4805_v8 }
  0x5e   :  { %4185 = vmatprep.subr.bf16.mxu0 %v4591_v0  ;;  %v1212_v41 = vsub.f32 %v1210_v32, %v1211_v36 }
  0x60   :  { %v1213_v47 = vand.u32 4294901760, %v1212_v41 }
  0x61   :  { %4187 = vmatpush3.bf16.msra.mxu0 %v4815_v9 }
  0x62   :  { %4188 = vmatprep.subr.bf16.mxu0 %v4591_v0 }
  0x65   :  { %4190 = vmatpush3.bf16.msra.mxu0 %v4819_v10 }
  0x66   :  { %4191 = vmatprep.subr.bf16.mxu0 %v4591_v0 }
  0x68   :  { %3660 = vmatmul.mubr.f32.vlgmr.msra.gmra.mrb[0].mxu0 %v4661_v19 }
  0x69   :  { %4193 = vmatpush3.bf16.msra.mxu0 %v4657_v13  ;;  %3678 = vmatprep.mubr.msk.f32.mxu0 %vm4592_vm0, %v4593_v1 }
  0x6a   :  { %4194 = vmatprep.subr.bf16.mxu0 %v4591_v0 }
  0x6d   :  { %4196 = vmatpush3.bf16.msra.mxu0 %v4666_v21 }
  0x6e   :  { %4197 = vmatprep.subr.bf16.mxu0 %v4591_v0 }
  0x71   :  { %4199 = vmatpush3.bf16.msra.mxu0 %v4689_v34 }
  0x72   :  { %4200 = vmatprep.subr.bf16.mxu0 %v4591_v0 }
  0x75   :  { %4202 = vmatpush3.bf16.msra.mxu0 %v4700_v38 }
  0x76   :  { %4275 = vmatprep.subr.bf16.mxu0 %v4591_v0 }
  0x78   :  { %3679 = vmatmul.mubr.f32.vlgmr.msra.gmra.mrb[0].mxu0 %v4661_v19 }
  0x79   :  { %3801 = vmatprep.mubr.msk.f32.mxu0 %vm4592_vm0, %v4593_v1 }
  0xa7   :  { %v1135_v56 = vpop.permute.xlu0 %1134 }
 0x14b   :  { %v584_v14 = vpop.f32.mrb[0].mxu0 }
 0x14c   :  { %v589_v15 = vsel %vm47_vm1, %v584_v14, 0  ;;  %v1145_v16 = vand.u32 4294901760, %v584_v14  ;;  %v3680_v17 = vpop.f32.mrb[1].mxu0 }
 0x14d   :  { %v664_v18 = vand.u32 4294901760, %v589_v15 }
 0x14e   :  { %v4842_v20 = vpack.c.bf16 %v1145_v16, %v1142_v11  ;;  %v4844_v22 = vsub.f32 %v584_v14, %v1145_v16 }
 0x14f   :  { %v665_v23 = vsub.f32 %v589_v15, %v664_v18 }
 0x150   :  { %4277 = vmatpush3.bf16.msra.mxu0 %v4842_v20  ;;  %v1229_v33 = vand.u32 4294901760, %v4844_v22 }
 0x151   :  { %v666_v19 = vand.u32 4294901760, %v665_v23  ;;  %3799 = vmatprep.subr.mxu0 %v4593_v1 }
 0x152   :  { %v1230_v37 = vsub.f32 %v4844_v22, %v1229_v33  ;;  %v4288_v55 = vpack.c.bf16 %v1229_v33, %v1222_v35 }
 0x153   :  { %v667_v24 = vsub.f32 %v665_v23, %v666_v19 }
 0x154   :  { %v1231_v44 = vand.u32 4294901760, %v1230_v37 }
 0x155   :  { %v668_v25 = vand.u32 4294901760, %v667_v24 }
 0x156   :  { %v4279_v50 = vpack.c.bf16 %v1231_v44, %v1224_v46 }
 0x157   :  { %3698 = vmatmul.mubr.f32.vlgmr.msra.gmra.mrb[0].mxu1 %v668_v25 }
 0x158   :  { %4217 = vmatpush3.bf16.msra.mxu1 %v4730_v52  ;;  %3716 = vmatprep.mubr.msk.f32.mxu1 %vm4592_vm0, %v4593_v1 }
 0x159   :  { %4218 = vmatprep.subr.bf16.mxu1 %v4591_v0 }
 0x15c   :  { %4220 = vmatpush3.bf16.msra.mxu1 %v4738_v57 }
 0x15d   :  { %4221 = vmatprep.subr.bf16.mxu1 %v4591_v0 }
 0x160   :  { %4223 = vmatpush3.bf16.msra.mxu1 %v4745_v61 }
 0x161   :  { %4224 = vmatprep.subr.bf16.mxu1 %v4591_v0 }
 0x164   :  { %4226 = vmatpush3.bf16.msra.mxu1 %v4749_v2 }
 0x165   :  { %4227 = vmatprep.subr.bf16.mxu1 %v4591_v0 }
 0x167   :  { %3717 = vmatmul.mubr.f32.vlgmr.msra.gmra.mrb[0].mxu1 %v664_v18 }
 0x168   :  { %4229 = vmatpush3.bf16.msra.mxu1 %v4755_v3  ;;  %3735 = vmatprep.mubr.msk.f32.mxu1 %vm4592_vm0, %v4593_v1 }
 0x169   :  { %4230 = vmatprep.subr.bf16.mxu1 %v4591_v0 }
 0x16c   :  { %4232 = vmatpush3.bf16.msra.mxu1 %v4762_v4 }
 0x16d   :  { %4233 = vmatprep.subr.bf16.mxu1 %v4591_v0 }
 0x170   :  { %4235 = vmatpush3.bf16.msra.mxu1 %v4770_v5 }
 0x171   :  { %4236 = vmatprep.subr.bf16.mxu1 %v4591_v0 }
 0x174   :  { %4238 = vmatpush3.bf16.msra.mxu1 %v4776_v6 }
 0x175   :  { %4239 = vmatprep.subr.bf16.mxu1 %v4591_v0 }
 0x177   :  { %3736 = vmatmul.mubr.f32.vlgmr.msra.gmra.mrb[0].mxu1 %v665_v23 }
 0x178   :  { %4241 = vmatpush3.bf16.msra.mxu1 %v4657_v13  ;;  %3754 = vmatprep.mubr.msk.f32.mxu1 %vm4592_vm0, %v4593_v1 }
 0x179   :  { %4242 = vmatprep.subr.bf16.mxu1 %v4591_v0 }
 0x17c   :  { %4244 = vmatpush3.bf16.msra.mxu1 %v4666_v21 }
 0x17d   :  { %4245 = vmatprep.subr.bf16.mxu1 %v4591_v0 }
 0x180   :  { %4247 = vmatpush3.bf16.msra.mxu1 %v4689_v34 }
 0x181   :  { %4248 = vmatprep.subr.bf16.mxu1 %v4591_v0 }
 0x184   :  { %4250 = vmatpush3.bf16.msra.mxu1 %v4700_v38 }
 0x185   :  { %4251 = vmatprep.subr.bf16.mxu1 %v4591_v0 }
 0x187   :  { %3755 = vmatmul.mubr.f32.vlgmr.msra.gmra.mrb[0].mxu1 %v666_v19 }
 0x188   :  { %4253 = vmatpush3.bf16.msra.mxu1 %v4795_v7  ;;  %3773 = vmatprep.mubr.msk.f32.mxu1 %vm4592_vm0, %v4593_v1 }
 0x189   :  { %4254 = vmatprep.subr.bf16.mxu1 %v4591_v0 }
 0x18c   :  { %4256 = vmatpush3.bf16.msra.mxu1 %v4805_v8 }
 0x18d   :  { %4257 = vmatprep.subr.bf16.mxu1 %v4591_v0 }
 0x190   :  { %4259 = vmatpush3.bf16.msra.mxu1 %v4815_v9 }
 0x191   :  { %4260 = vmatprep.subr.bf16.mxu1 %v4591_v0 }
 0x194   :  { %4262 = vmatpush3.bf16.msra.mxu1 %v4819_v10 }
 0x195   :  { %4263 = vmatprep.subr.bf16.mxu1 %v4591_v0 }
 0x197   :  { %3774 = vmatmul.mubr.f32.vlgmr.msra.gmra.mrb[0].mxu1 %v664_v18 }
 0x198   :  { %4265 = vmatpush3.bf16.msra.mxu1 %v4657_v13  ;;  %3792 = vmatprep.mubr.msk.f32.mxu1 %vm4592_vm0, %v4593_v1 }
 0x199   :  { %4266 = vmatprep.subr.bf16.mxu1 %v4591_v0 }
 0x19c   :  { %4268 = vmatpush3.bf16.msra.mxu1 %v4666_v21 }
 0x19d   :  { %4269 = vmatprep.subr.bf16.mxu1 %v4591_v0 }
 0x1a0   :  { %4271 = vmatpush3.bf16.msra.mxu1 %v4689_v34 }
 0x1a1   :  { %4272 = vmatprep.subr.bf16.mxu1 %v4591_v0 }
 0x1a4   :  { %4274 = vmatpush3.bf16.msra.mxu1 %v4700_v38 }
 0x1a5   :  { %4293 = vmatprep.subr.bf16.mxu1 %v4591_v0 }
 0x1a7   :  { %3793 = vmatmul.mubr.f32.vlgmr.msra.gmra.mrb[0].mxu1 %v664_v18 }
 0x1a8   :  { %4295 = vmatpush3.bf16.msra.mxu1 %v4657_v13  ;;  %3865 = vmatprep.mubr.msk.f32.mxu1 %vm4592_vm0, %v4593_v1 }
 0x1a9   :  { %4296 = vmatprep.subr.bf16.mxu1 %v4591_v0 }
 0x1ac   :  { %4298 = vmatpush3.bf16.msra.mxu1 %v4666_v21 }
 0x1ad   :  { %4299 = vmatprep.subr.bf16.mxu1 %v4591_v0 }
 0x1b0   :  { %4301 = vmatpush3.bf16.msra.mxu1 %v4689_v34 }
 0x1b1   :  { %4302 = vmatprep.subr.bf16.mxu1 %v4591_v0 }
 0x1b4   :  { %4304 = vmatpush3.bf16.msra.mxu1 %v4700_v38 }
 0x1b5   :  { %4305 = vmatprep.subr.bf16.mxu1 %v4591_v0 }
 0x27a   :  { %v1124_v40 = vpop.f32.mrb[0].mxu1 }
 0x27b   :  { %v1128_v42 = vmul.f32 2.0, %v1124_v40  ;;  %v3794_v43 = vpop.f32.mrb[1].mxu1 }
 0x27d   :  { %v1129_v45 = vsub.f32 %v1128_v42, %v4655_v12  ;;  %v4282_v12 = vpack.c.bf16 %v4844_v22, %v1221_v31 }
 0x27f   :  { %v1148_v48 = vand.u32 4294901760, %v1129_v45 }
 0x281   :  { %v1235_v49 = vsub.f32 %v1129_v45, %v1148_v48  ;;  %3800 = vmatpush3.msra.mxu0 %v1148_v48 }
 0x282   :  { %3802 = vmatmul.mubr.f32.vlgmr.msra.gmra.mrb[2].mxu0 %v1213_v47  ;;  %4278 = vmatprep.subr.bf16.mxu0 %v4591_v0 }
 0x283   :  { %v1236_v51 = vand.u32 4294901760, %v1235_v49  ;;  %4280 = vmatpush3.bf16.msra.mxu0 %v4279_v50  ;;  %3810 = vmatprep.mubr.msk.f32.mxu0 %vm4592_vm0, %v4593_v1 }
 0x284   :  { %3808 = vmatprep.subr.mxu0 %v4593_v1 }
 0x285   :  { %v1237_v53 = vsub.f32 %v1235_v49, %v1236_v51 }
 0x287   :  { %v1238_v54 = vand.u32 4294901760, %v1237_v53 }
 0x289   :  { %3809 = vmatpush3.msra.mxu0 %v1238_v54 }
 0x28a   :  { %3811 = vmatmul.mubr.f32.vlgmr.msra.gmra.mrb[2].mxu0 %v1209_v30  ;;  %4281 = vmatprep.subr.bf16.mxu0 %v4591_v0 }
 0x28b   :  { %4283 = vmatpush3.bf16.msra.mxu0 %v4282_v12  ;;  %3819 = vmatprep.mubr.msk.f32.mxu0 %vm4592_vm0, %v4593_v1 }
 0x28c   :  { %3817 = vmatprep.subr.mxu0 %v4593_v1 }
 0x28f   :  { %3818 = vmatpush3.msra.mxu0 %v1235_v49 }
 0x290   :  { %4284 = vmatprep.subr.bf16.mxu0 %v4591_v0 }
 0x292   :  { %3820 = vmatmul.mubr.f32.vlgmr.msra.gmra.mrb[2].mxu0 %v1210_v32 }
 0x293   :  { %4286 = vmatpush3.bf16.msra.mxu0 %v4842_v20  ;;  %3828 = vmatprep.mubr.msk.f32.mxu0 %vm4592_vm0, %v4593_v1 }
 0x294   :  { %3826 = vmatprep.subr.mxu0 %v4593_v1 }
 0x297   :  { %3827 = vmatpush3.msra.mxu0 %v1148_v48 }
 0x298   :  { %4287 = vmatprep.subr.bf16.mxu0 %v4591_v0 }
 0x29a   :  { %3829 = vmatmul.mubr.f32.vlgmr.msra.gmra.mrb[2].mxu0 %v1211_v36 }
 0x29b   :  { %4289 = vmatpush3.bf16.msra.mxu0 %v4288_v55  ;;  %3837 = vmatprep.mubr.msk.f32.mxu0 %vm4592_vm0, %v4593_v1 }
 0x29c   :  { %3835 = vmatprep.subr.mxu0 %v4593_v1 }
 0x29f   :  { %3836 = vmatpush3.msra.mxu0 %v1236_v51 }
 0x2a0   :  { %4290 = vmatprep.subr.bf16.mxu0 %v4591_v0 }
 0x2a2   :  { %3838 = vmatmul.mubr.f32.vlgmr.msra.gmra.mrb[2].mxu0 %v1209_v30 }
 0x2a3   :  { %4292 = vmatpush3.bf16.msra.mxu0 %v4842_v20  ;;  %3846 = vmatprep.mubr.msk.f32.mxu0 %vm4592_vm0, %v4593_v1 }
 0x2a4   :  { %3844 = vmatprep.subr.mxu0 %v4593_v1 }
 0x2a7   :  { %3845 = vmatpush3.msra.mxu0 %v1148_v48 }
 0x2a8   :  { %4365 = vmatprep.subr.bf16.mxu0 %v4591_v0 }
 0x2aa   :  { %3847 = vmatmul.mubr.f32.vlgmr.msra.gmra.mrb[2].mxu0 %v1209_v30 }
 0x2ab   :  { %4367 = vmatpush3.bf16.msra.mxu0 %v4657_v13  ;;  %3979 = vmatprep.mubr.msk.f32.mxu0 %vm4592_vm0, %v4593_v1 }
 0x2ac   :  { %4368 = vmatprep.subr.bf16.mxu0 %v4591_v0 }
 0x2af   :  { %4370 = vmatpush3.bf16.msra.mxu0 %v4666_v21 }
 0x2b0   :  { %4371 = vmatprep.subr.bf16.mxu0 %v4591_v0 }
 0x2b3   :  { %4373 = vmatpush3.bf16.msra.mxu0 %v4689_v34 }
 0x2b4   :  { %4374 = vmatprep.subr.bf16.mxu0 %v4591_v0 }
 0x2b7   :  { %4376 = vmatpush3.bf16.msra.mxu0 %v4700_v38 }
 0x2b8   :  { %4377 = vmatprep.subr.bf16.mxu0 %v4591_v0 }
 0x37d   :  { %v1609_v58 = vpop.f32.mrb[2].mxu0 }
 0x37e   :  { %v4461_v59 = vadd.f32 %v1609_v58, %v1135_v56  ;;  %v3848_v60 = vpop.f32.mrb[3].mxu0 }
 0x380   :  { %v1613_v62 = vsel %vm47_vm1, %v4461_v59, 0.0  ;;  %v1617_v63 = vmul.f32 %v4461_v59, %v4461_v59 }
 0x381   :  { %1614 = vadd.xlane.f32.xlu0 %v1613_v62 }
 0x382   :  { %v1618_v11 = vsel %vm47_vm1, %v1617_v63, 0.0 }
 0x383   :  { %1619 = vadd.xlane.f32.xlu1 %v1618_v11 }
 0x40e   :  { %v1615_v14 = vpop.xlane.xlu0 %1614 }
 0x40f   :  { %v1616_v15 = vmul.f32 0.015625, %v1615_v14 }
 0x410   :  { %v1620_v16 = vpop.xlane.xlu1 %1619 }
 0x411   :  { %v1622_v17 = vmul.f32 %v1616_v15, %v1616_v15  ;;  %v1621_v18 = vmul.f32 0.015625, %v1620_v16  ;;  %v1624_v23 = vsub.f32 %v4461_v59, %v1616_v15 }
 0x413   :  { %v1623_v20 = vsub.f32 %v1621_v18, %v1622_v17 }
 0x415   :  { %v1625_v22 = vadd.f32 1e-05, %v1623_v20 }
 0x417   :  { %4534 = vrsqrt.f32 %v1625_v22 }
 0x421   :  { %v4535_v19 = vpop.eup %4534 }
 0x422   :  { %v1627_v24 = vmul.f32 %v4535_v19, %v1624_v23 }
 0x424   :  { %v4957_v25 = vmax.f32 %v1627_v24, 0.0 }
 0x426   :  { %v1630_v26 = vsel %vm47_vm1, %v4957_v25, 0  ;;  %v2732_v35 = vand.u32 4294901760, %v4957_v25 }
 0x427   :  { %v1705_v27 = vand.u32 4294901760, %v1630_v26 }
 0x429   :  { %v1706_v28 = vsub.f32 %v1630_v26, %v1705_v27 }
 0x42b   :  { %v1707_v29 = vand.u32 4294901760, %v1706_v28 }
 0x42d   :  { %v1708_v30 = vsub.f32 %v1706_v28, %v1707_v29 }
 0x42f   :  { %v1709_v31 = vand.u32 4294901760, %v1708_v30 }
 0x431   :  { %3866 = vmatmul.mubr.f32.vlgmr.msra.gmra.mrb[2].mxu1 %v1709_v31 }
 0x432   :  { %4307 = vmatpush3.bf16.msra.mxu1 %v4730_v52  ;;  %3884 = vmatprep.mubr.msk.f32.mxu1 %vm4592_vm0, %v4593_v1 }
 0x433   :  { %4308 = vmatprep.subr.bf16.mxu1 %v4591_v0 }
 0x436   :  { %4310 = vmatpush3.bf16.msra.mxu1 %v4738_v57 }
 0x437   :  { %4311 = vmatprep.subr.bf16.mxu1 %v4591_v0 }
 0x43a   :  { %4313 = vmatpush3.bf16.msra.mxu1 %v4745_v61 }
 0x43b   :  { %4314 = vmatprep.subr.bf16.mxu1 %v4591_v0 }
 0x43e   :  { %4316 = vmatpush3.bf16.msra.mxu1 %v4749_v2 }
 0x43f   :  { %4317 = vmatprep.subr.bf16.mxu1 %v4591_v0 }
 0x441   :  { %3885 = vmatmul.mubr.f32.vlgmr.msra.gmra.mrb[2].mxu1 %v1705_v27 }
 0x442   :  { %4319 = vmatpush3.bf16.msra.mxu1 %v4755_v3  ;;  %3903 = vmatprep.mubr.msk.f32.mxu1 %vm4592_vm0, %v4593_v1 }
 0x443   :  { %4320 = vmatprep.subr.bf16.mxu1 %v4591_v0 }
 0x446   :  { %4322 = vmatpush3.bf16.msra.mxu1 %v4762_v4 }
 0x447   :  { %4323 = vmatprep.subr.bf16.mxu1 %v4591_v0 }
 0x44a   :  { %4325 = vmatpush3.bf16.msra.mxu1 %v4770_v5 }
 0x44b   :  { %4326 = vmatprep.subr.bf16.mxu1 %v4591_v0 }
 0x44e   :  { %4328 = vmatpush3.bf16.msra.mxu1 %v4776_v6 }
 0x44f   :  { %4329 = vmatprep.subr.bf16.mxu1 %v4591_v0 }
 0x451   :  { %3904 = vmatmul.mubr.f32.vlgmr.msra.gmra.mrb[2].mxu1 %v1706_v28 }
 0x452   :  { %4331 = vmatpush3.bf16.msra.mxu1 %v4657_v13  ;;  %3922 = vmatprep.mubr.msk.f32.mxu1 %vm4592_vm0, %v4593_v1 }
 0x453   :  { %4332 = vmatprep.subr.bf16.mxu1 %v4591_v0 }
 0x456   :  { %4334 = vmatpush3.bf16.msra.mxu1 %v4666_v21 }
 0x457   :  { %4335 = vmatprep.subr.bf16.mxu1 %v4591_v0 }
 0x45a   :  { %4337 = vmatpush3.bf16.msra.mxu1 %v4689_v34 }
 0x45b   :  { %4338 = vmatprep.subr.bf16.mxu1 %v4591_v0 }
 0x45e   :  { %4340 = vmatpush3.bf16.msra.mxu1 %v4700_v38 }
 0x45f   :  { %4341 = vmatprep.subr.bf16.mxu1 %v4591_v0 }
 0x461   :  { %3923 = vmatmul.mubr.f32.vlgmr.msra.gmra.mrb[2].mxu1 %v1707_v29 }
 0x462   :  { %4343 = vmatpush3.bf16.msra.mxu1 %v4795_v7  ;;  %3941 = vmatprep.mubr.msk.f32.mxu1 %vm4592_vm0, %v4593_v1 }
 0x463   :  { %4344 = vmatprep.subr.bf16.mxu1 %v4591_v0 }
 0x466   :  { %4346 = vmatpush3.bf16.msra.mxu1 %v4805_v8 }
 0x467   :  { %4347 = vmatprep.subr.bf16.mxu1 %v4591_v0 }
 0x46a   :  { %4349 = vmatpush3.bf16.msra.mxu1 %v4815_v9 }
 0x46b   :  { %4350 = vmatprep.subr.bf16.mxu1 %v4591_v0 }
 0x46e   :  { %4352 = vmatpush3.bf16.msra.mxu1 %v4819_v10 }
 0x46f   :  { %4353 = vmatprep.subr.bf16.mxu1 %v4591_v0 }
 0x471   :  { %3942 = vmatmul.mubr.f32.vlgmr.msra.gmra.mrb[2].mxu1 %v1705_v27 }
 0x472   :  { %4355 = vmatpush3.bf16.msra.mxu1 %v4657_v13  ;;  %3960 = vmatprep.mubr.msk.f32.mxu1 %vm4592_vm0, %v4593_v1 }
 0x473   :  { %4356 = vmatprep.subr.bf16.mxu1 %v4591_v0 }
 0x476   :  { %4358 = vmatpush3.bf16.msra.mxu1 %v4666_v21 }
 0x477   :  { %4359 = vmatprep.subr.bf16.mxu1 %v4591_v0 }
 0x47a   :  { %4361 = vmatpush3.bf16.msra.mxu1 %v4689_v34 }
 0x47b   :  { %4362 = vmatprep.subr.bf16.mxu1 %v4591_v0 }
 0x47e   :  { %4364 = vmatpush3.bf16.msra.mxu1 %v4700_v38 }
 0x481   :  { %3961 = vmatmul.mubr.f32.vlgmr.msra.gmra.mrb[2].mxu1 %v1705_v27 }
 0x554   :  { %v2165_v32 = vpop.f32.mrb[2].mxu1 }
 0x555   :  { %v2170_v33 = vsel %vm47_vm1, %v2165_v32, 0  ;;  %v2735_v36 = vand.u32 4294901760, %v2165_v32  ;;  %v3962_v37 = vpop.f32.mrb[3].mxu1 }
 0x556   :  { %v2245_v39 = vand.u32 4294901760, %v2170_v33 }
 0x557   :  { %v5014_v40 = vpack.c.bf16 %v2735_v36, %v2732_v35  ;;  %v5016_v41 = vsub.f32 %v2165_v32, %v2735_v36 }
 0x558   :  { %v2246_v42 = vsub.f32 %v2170_v33, %v2245_v39 }
 0x559   :  { %4438 = vmatprep.subr.bf16.mxu1 %v5014_v40 }
 0x55a   :  { %v2247_v43 = vand.u32 4294901760, %v2246_v42  ;;  %4440 = vmatpush3.bf16.msra.mxu1 %v5014_v40 }
 0x55c   :  { %v2248_v44 = vsub.f32 %v2246_v42, %v2247_v43 }
 0x55e   :  { %v2249_v45 = vand.u32 4294901760, %v2248_v44 }
 0x560   :  { %3980 = vmatmul.mubr.f32.vlgmr.msra.gmra.mrb[4].mxu0 %v2249_v45 }
 0x561   :  { %4379 = vmatpush3.bf16.msra.mxu0 %v4730_v52  ;;  %3998 = vmatprep.mubr.msk.f32.mxu0 %vm4592_vm0, %v4593_v1 }
 0x562   :  { %4380 = vmatprep.subr.bf16.mxu0 %v4591_v0 }
 0x565   :  { %4382 = vmatpush3.bf16.msra.mxu0 %v4738_v57 }
 0x566   :  { %4383 = vmatprep.subr.bf16.mxu0 %v4591_v0 }
 0x569   :  { %4385 = vmatpush3.bf16.msra.mxu0 %v4745_v61 }
 0x56a   :  { %4386 = vmatprep.subr.bf16.mxu0 %v4591_v0 }
 0x56d   :  { %4388 = vmatpush3.bf16.msra.mxu0 %v4749_v2 }
 0x56e   :  { %4389 = vmatprep.subr.bf16.mxu0 %v4591_v0 }
 0x570   :  { %3999 = vmatmul.mubr.f32.vlgmr.msra.gmra.mrb[4].mxu0 %v2245_v39 }
 0x571   :  { %4391 = vmatpush3.bf16.msra.mxu0 %v4755_v3  ;;  %4017 = vmatprep.mubr.msk.f32.mxu0 %vm4592_vm0, %v4593_v1 }
 0x572   :  { %4392 = vmatprep.subr.bf16.mxu0 %v4591_v0 }
 0x575   :  { %4394 = vmatpush3.bf16.msra.mxu0 %v4762_v4 }
 0x576   :  { %4395 = vmatprep.subr.bf16.mxu0 %v4591_v0 }
 0x579   :  { %4397 = vmatpush3.bf16.msra.mxu0 %v4770_v5  ;;  %v2821_v5 = vsub.f32 %v4957_v25, %v2732_v35 }
 0x57a   :  { %4398 = vmatprep.subr.bf16.mxu0 %v4591_v0 }
 0x57b   :  { %v4445_v63 = vpack.c.bf16 %v5016_v41, %v2821_v5 }
 0x57d   :  { %4400 = vmatpush3.bf16.msra.mxu0 %v4776_v6 }
 0x57e   :  { %4401 = vmatprep.subr.bf16.mxu0 %v4591_v0 }
 0x580   :  { %4018 = vmatmul.mubr.f32.vlgmr.msra.gmra.mrb[4].mxu0 %v2246_v42 }
 0x581   :  { %4403 = vmatpush3.bf16.msra.mxu0 %v4657_v13  ;;  %4036 = vmatprep.mubr.msk.f32.mxu0 %vm4592_vm0, %v4593_v1 }
 0x582   :  { %4404 = vmatprep.subr.bf16.mxu0 %v4591_v0 }
 0x585   :  { %4406 = vmatpush3.bf16.msra.mxu0 %v4666_v21 }
 0x586   :  { %4407 = vmatprep.subr.bf16.mxu0 %v4591_v0 }
 0x589   :  { %4409 = vmatpush3.bf16.msra.mxu0 %v4689_v34 }
 0x58a   :  { %4410 = vmatprep.subr.bf16.mxu0 %v4591_v0 }
 0x58d   :  { %4412 = vmatpush3.bf16.msra.mxu0 %v4700_v38 }
 0x58e   :  { %4413 = vmatprep.subr.bf16.mxu0 %v4591_v0 }
 0x590   :  { %4037 = vmatmul.mubr.f32.vlgmr.msra.gmra.mrb[4].mxu0 %v2247_v43 }
 0x591   :  { %4415 = vmatpush3.bf16.msra.mxu0 %v4795_v7  ;;  %4055 = vmatprep.mubr.msk.f32.mxu0 %vm4592_vm0, %v4593_v1  ;;  %v2829_v7 = vand.u32 4294901760, %v5016_v41 }
 0x592   :  { %4416 = vmatprep.subr.bf16.mxu0 %v4591_v0 }
 0x595   :  { %4418 = vmatpush3.bf16.msra.mxu0 %v4805_v8 }
 0x596   :  { %4419 = vmatprep.subr.bf16.mxu0 %v4591_v0 }
 0x599   :  { %4421 = vmatpush3.bf16.msra.mxu0 %v4815_v9  ;;  %v2822_v9 = vand.u32 4294901760, %v2821_v5 }
 0x59a   :  { %4422 = vmatprep.subr.bf16.mxu0 %v4591_v0 }
 0x59b   :  { %v2823_v50 = vsub.f32 %v2821_v5, %v2822_v9  ;;  %v4453_v11 = vpack.c.bf16 %v2829_v7, %v2822_v9 }
 0x59d   :  { %4424 = vmatpush3.bf16.msra.mxu0 %v4819_v10  ;;  %v2830_v10 = vsub.f32 %v5016_v41, %v2829_v7  ;;  %v2824_v55 = vand.u32 4294901760, %v2823_v50 }
 0x59e   :  { %4425 = vmatprep.subr.bf16.mxu0 %v4591_v0 }
 0x59f   :  { %v2831_v53 = vand.u32 4294901760, %v2830_v10 }
 0x5a0   :  { %4056 = vmatmul.mubr.f32.vlgmr.msra.gmra.mrb[4].mxu0 %v2245_v39 }
 0x5a1   :  { %4427 = vmatpush3.bf16.msra.mxu0 %v4657_v13  ;;  %4074 = vmatprep.mubr.msk.f32.mxu0 %vm4592_vm0, %v4593_v1  ;;  %v2711_v13 = vld [vmem:[%s5125_s4] sm:$0xff]  ;;  %v4441_v58 = vpack.c.bf16 %v2831_v53, %v2824_v55 }
 0x5a2   :  { %4428 = vmatprep.subr.bf16.mxu0 %v4591_v0  ;;  %v2726_v52 = vsel %vm1137_vm2, %v2711_v13, 0 }
 0x5a3   :  { %v5073_v1 = vand.u32 4294901760, %v2726_v52 }
 0x5a5   :  { %4430 = vmatpush3.bf16.msra.mxu0 %v4666_v21  ;;  %v2800_v57 = vsub.f32 %v2726_v52, %v5073_v1 }
 0x5a6   :  { %4431 = vmatprep.subr.bf16.mxu0 %v4591_v0 }
 0x5a7   :  { %v2801_v21 = vand.u32 4294901760, %v2800_v57 }
 0x5a9   :  { %4433 = vmatpush3.bf16.msra.mxu0 %v4689_v34  ;;  %v2802_v61 = vsub.f32 %v2800_v57, %v2801_v21  ;;  %v2714_v34 = vld [vmem:[%s5126_s5 + $0x8] sm:$0xff] }
 0x5aa   :  { %4434 = vmatprep.subr.bf16.mxu0 %v4591_v0  ;;  %v2713_v0 = vld [vmem:[%s5126_s5] sm:$0xff] }
 0x5ab   :  { %v2803_v2 = vand.u32 4294901760, %v2802_v61  ;;  %2717 = vperm.xlu1 %4533, %v2713_v0  }
 0x5ad   :  { %4436 = vmatpush3.bf16.msra.mxu0 %v4700_v38  ;;  %4083 = vmatprep.mubr.f32.mxu1 %v2803_v2  ;;  %v2712_v38 = vld [vmem:[%s5125_s4 + $0x8] sm:$0xff]  ;;  %s4595_s4 = smov [#allocation5]  }
 0x5ae   :  { %v2729_v3 = vsel %vm1137_vm2, %v2712_v38, 0  ;;  %s3285_s5 = sshll.u32 %s4595_s4, 4  ;;  %s3286_s5 = int_to_ptr.vmem [resolvable:$true] %s3285_s5 }
 0x5af   :  { %2722 = vperm.xlu1 %4533, %v2714_v34   ;;  %v2809_v4 = vand.u32 4294901760, %v2729_v3  ;;  %s4562_s21 = scalar_lea.vmem %s3286_s5, 256  ;;  %p4567_p9 = scmp.lt.s32.totalorder %s3286_s5, %s3286_s5 }
 0x5b0   :  { %4075 = vmatmul.mubr.f32.vlgmr.msra.gmra.mrb[4].mxu0 %v2245_v39  ;;  %p4563_p8 = scmp.ne.s32.totalorder %s3286_s5, %s4562_s21  ;;  %p4568_p10 = scmp.lt.s32.totalorder %s4562_s21, %s4562_s21 }
 0x5b1   :  { %v2810_v6 = vsub.f32 %v2729_v3, %v2809_v4 }
 0x5b2   :  { %p4569_p11 = por %p4568_p10, %p4567_p9 }
 0x5b3   :  { %v2811_v8 = vand.u32 4294901760, %v2810_v6 }
 0x5b4   :  { %p4570_p12 = pnand %p4569_p11, %p4563_p8 }
 0x5b5   :  { %v2812_v49 = vsub.f32 %v2810_v6, %v2811_v8 }
 0x5b7   :  { %v2813_v12 = vand.u32 4294901760, %v2812_v49 }
 0x62a   :  { %v2718_v14 = vpop.permute.xlu1 %2717 }
 0x62e   :  { %v2723_v15 = vpop.permute.xlu1 %2722 }
 0x683   :  { %v2705_v46 = vpop.f32.mrb[4].mxu0 }
 0x684   :  { %v2709_v47 = vmul.f32 2.0, %v2705_v46  ;;  %v4076_v48 = vpop.f32.mrb[5].mxu0 }
 0x686   :  { %v2710_v51 = vsub.f32 %v2709_v47, %v4957_v25 }
 0x688   :  { %v2738_v54 = vand.u32 4294901760, %v2710_v51 }
 0x68a   :  { %v2835_v56 = vsub.f32 %v2710_v51, %v2738_v54  ;;  %4081 = vmatprep.subr.mxu1 %v2738_v54 }
 0x68b   :  { %4082 = vmatpush3.msra.mxu1 %v2738_v54 }
 0x68c   :  { %4084 = vmatmul.mubr.f32.vlgmr.msra.gmra.mrb[4].mxu1 %v2813_v12  ;;  %4442 = vmatprep.subr.bf16.mxu1 %v4441_v58  ;;  %v2836_v59 = vand.u32 4294901760, %v2835_v56 }
 0x68d   :  { %4444 = vmatpush3.bf16.msra.mxu1 %v4441_v58  ;;  %4092 = vmatprep.mubr.f32.mxu1 %v5073_v1 }
 0x68e   :  { %v2837_v60 = vsub.f32 %v2835_v56, %v2836_v59 }
 0x690   :  { %v2838_v62 = vand.u32 4294901760, %v2837_v60 }
 0x692   :  { %4090 = vmatprep.subr.mxu1 %v2838_v62 }
 0x693   :  { %4091 = vmatpush3.msra.mxu1 %v2838_v62 }
 0x694   :  { %4093 = vmatmul.mubr.f32.vlgmr.msra.gmra.mrb[4].mxu1 %v2809_v4  ;;  %4446 = vmatprep.subr.bf16.mxu1 %v4445_v63 }
 0x695   :  { %4448 = vmatpush3.bf16.msra.mxu1 %v4445_v63  ;;  %4101 = vmatprep.mubr.f32.mxu1 %v2800_v57 }
 0x696   :  { %4099 = vmatprep.subr.mxu1 %v2835_v56 }
 0x699   :  { %4100 = vmatpush3.msra.mxu1 %v2835_v56 }
 0x69a   :  { %4450 = vmatprep.subr.bf16.mxu1 %v5014_v40 }
 0x69c   :  { %4102 = vmatmul.mubr.f32.vlgmr.msra.gmra.mrb[4].mxu1 %v2810_v6 }
 0x69d   :  { %4452 = vmatpush3.bf16.msra.mxu1 %v5014_v40  ;;  %4110 = vmatprep.mubr.f32.mxu1 %v2801_v21 }
 0x69e   :  { %4108 = vmatprep.subr.mxu1 %v2738_v54 }
 0x6a1   :  { %4109 = vmatpush3.msra.mxu1 %v2738_v54 }
 0x6a2   :  { %4454 = vmatprep.subr.bf16.mxu1 %v4453_v11 }
 0x6a4   :  { %4111 = vmatmul.mubr.f32.vlgmr.msra.gmra.mrb[4].mxu1 %v2811_v8 }
 0x6a5   :  { %4456 = vmatpush3.bf16.msra.mxu1 %v4453_v11  ;;  %4119 = vmatprep.mubr.f32.mxu1 %v5073_v1 }
 0x6a6   :  { %4117 = vmatprep.subr.mxu1 %v2836_v59 }
 0x6a9   :  { %4118 = vmatpush3.msra.mxu1 %v2836_v59 }
 0x6aa   :  { %4458 = vmatprep.subr.bf16.mxu1 %v5014_v40 }
 0x6ac   :  { %4120 = vmatmul.mubr.f32.vlgmr.msra.gmra.mrb[4].mxu1 %v2809_v4 }
 0x6ad   :  { %4460 = vmatpush3.bf16.msra.mxu1 %v5014_v40  ;;  %4128 = vmatprep.mubr.f32.mxu1 %v5073_v1 }
 0x6ae   :  { %4126 = vmatprep.subr.mxu1 %v2738_v54 }
 0x6b1   :  { %4127 = vmatpush3.msra.mxu1 %v2738_v54 }
 0x6b4   :  { %4129 = vmatmul.mubr.f32.vlgmr.msra.gmra.mrb[4].mxu1 %v2809_v4 }
 0x787   :  { %v4130_v16 = vpop.f32.mrb[4].mxu1 }
 0x788   :  { %v4462_v17 = vadd.f32 %v4130_v16, %v2723_v15  ;;  %v3236_v18 = vpop.f32.mrb[5].mxu1 }
 0x789   :  { %v4463_v20 = vadd.f32 %v3236_v18, %v2718_v14 }
 0x78a   :  { %v3249_v22 = vsel %vm47_vm1, %v4462_v17, 0.0  ;;  %v3255_v25 = vmul.f32 %v4462_v17, %v4462_v17 }
 0x78b   :  { %3250 = vadd.xlane.f32.xlu0 %v3249_v22  ;;  %v3246_v23 = vsel %vm47_vm1, %v4463_v20, 0.0  ;;  %v3254_v19 = vmul.f32 %v4463_v20, %v4463_v20 }
 0x78c   :  { %3247 = vadd.xlane.f32.xlu1 %v3246_v23  ;;  %v3259_v26 = vsel %vm47_vm1, %v3255_v25, 0.0 }
 0x78d   :  { %v3256_v24 = vsel %vm47_vm1, %v3254_v19, 0.0 }
 0x78f   :  { %3257 = vadd.xlane.f32.xlu0 %v3256_v24 }
 0x793   :  { %3260 = vadd.xlane.f32.xlu0 %v3259_v26 }
 0x818   :  { %v3251_v27 = vpop.xlane.xlu0 %3250 }
 0x819   :  { %v3248_v28 = vpop.xlane.xlu1 %3247  ;;  %v3253_v32 = vmul.f32 0.015625, %v3251_v27 }
 0x81a   :  { %v3252_v29 = vmul.f32 0.015625, %v3248_v28 }
 0x81b   :  { %v3265_v37 = vmul.f32 %v3253_v32, %v3253_v32  ;;  %v3269_v13 = vsub.f32 %v4462_v17, %v3253_v32 }
 0x81c   :  { %v3264_v30 = vmul.f32 %v3252_v29, %v3252_v29  ;;  %v3258_v31 = vpop.xlane.xlu0 %3257  ;;  %v3268_v43 = vsub.f32 %v4463_v20, %v3252_v29 }
 0x81d   :  { %v3262_v33 = vmul.f32 0.015625, %v3258_v31 }
 0x81f   :  { %v3266_v35 = vsub.f32 %v3262_v33, %v3264_v30 }
 0x820   :  { %v3261_v36 = vpop.xlane.xlu0 %3260 }
 0x821   :  { %v3270_v39 = vadd.f32 1e-05, %v3266_v35  ;;  %v3263_v40 = vmul.f32 0.015625, %v3261_v36 }
 0x823   :  { %4536 = vrsqrt.f32 %v3270_v39  ;;  %v3267_v41 = vsub.f32 %v3263_v40, %v3265_v37 }
 0x825   :  { %v3271_v42 = vadd.f32 1e-05, %v3267_v41 }
 0x827   :  { %4538 = vrsqrt.f32 %v3271_v42 }
 0x82d   :  { %v4537_v44 = vpop.eup %4536 }
 0x82e   :  { %v3274_v45 = vmul.f32 %v4537_v44, %v3268_v43 }
 0x830   :  { %v3276_v52 = vmax.f32 %v3274_v45, 0.0 }
 0x831   :  { %v4539_v1 = vpop.eup %4538 }
 0x832   :  { %v3275_v57 = vmul.f32 %v4539_v1, %v3269_v13  ;;  %3278 = vst.msk [vmem:[#allocation5] sm:$0xff] %vm47_vm1, %v3276_v52 }
 0x834   :  { %v3277_v21 = vmax.f32 %v3275_v57, 0.0 }
 0x836   :  { %3279 = vst.msk [vmem:[#allocation5 + $0x8] sm:$0xff] %vm47_vm1, %v3277_v21 }
 0x837   :  { %4573 = shalt.err (!%p4570_p12)
}
 0x838   :  { %s4574_s24 = scalar_lea.hbm %s5127_s6, 256 }
 0x839   :  { %p4575_p13 = scmp.ne.s32.totalorder %s5127_s6, %s4574_s24  ;;  %p4578_p0 = scmp.lt.u32.totalorder %s4574_s24, %s5127_s6 }
 0x83b   :  { %p4580_p1 = pnand %p4578_p0, %p4575_p13 }
 0x83d   :  { %4583 = shalt.err (!%p4580_p1)
}
 0x83e   :  { %3291 = dma.vmem_to_hbm [thread:$0]  %s3286_s5, 256, %s5127_s6, [#allocation4], %s4589_s7, %s4589_s7, %s4590_s8  }
 0x83f   :  { %4586 = dma.done.wait [#allocation4], 256  }
 0x840   :  { %4587 = vsyncadd [#allocation4], 4294967040 }
 0x841   :  { %3295 = vsyncpa [#allocation3], 1 }
 0x842   :  { %3296 = vsyncpa [#allocation4], 1 }

</bundles_post_ra>
